<compile_context>
chip_gen: v7x
topology: tpu7x:2x2x1
jax: 0.10.0
libtpu: 0.0.40
codegen_flags: <defaults>
</compile_context>

<pallas_src>
import jax
import jax.numpy as jnp
from jax import lax
from jax.experimental import pallas as pl
from jax.experimental.pallas import tpu as pltpu

EPS = 1e-5


def _make_adalin_kernel(eps, C, hw, hw_pad, chunk):
    n_chunks = hw_pad // chunk
    padded = hw_pad != hw
    inv_n = 1.0 / hw
    inv_nm1 = 1.0 / max(hw - 1, 1)          # torch.var(unbiased=True); guard HW==1
    n_ln = C * hw
    inv_nln = 1.0 / n_ln
    inv_nlnm1 = 1.0 / max(n_ln - 1, 1)
    offs = [j * chunk for j in range(n_chunks)]   # static offsets -> static slices

    def kernel(x_ref, gbr_ref, o_ref):
        # x_ref: (1, C, HW_pad)   gbr_ref: (1, 3, C, 1) = [gamma, beta, rho]   o_ref: like x
        gamma = gbr_ref[0, 0].astype(jnp.float32)        # (C, 1)
        beta = gbr_ref[0, 1].astype(jnp.float32)         # (C, 1)
        rho = gbr_ref[0, 2].astype(jnp.float32)          # (C, 1)

        def load(off):
            # (C, chunk) f32 view of the VMEM-resident block; only one chunk live at a time.
            return x_ref[0, :, off:off + chunk].astype(jnp.float32)

        # ---- pass 1: per-channel sums -> instance / layer means ----
        # (zero padding contributes nothing to the sums; true HW is used as divisor)
        s1 = jnp.zeros((C, 1), jnp.float32)
        for off in offs:
            s1 = s1 + jnp.sum(load(off), axis=1, keepdims=True)
        mu_in = s1 * inv_n                                # (C, 1)
        mu_ln = jnp.sum(s1) * inv_nln                     # scalar

        # ---- pass 2: centered sum of squares (stable, no cancellation) ----
        d2 = jnp.zeros((C, 1), jnp.float32)
        for off in offs:
            d = load(off) - mu_in
            if padded and off + chunk > hw:               # mask only the padded tail chunk
                lane = lax.broadcasted_iota(jnp.int32, (1, chunk), 1) + off
                d = jnp.where(lane < hw, d, 0.0)
            d2 = d2 + jnp.sum(d * d, axis=1, keepdims=True)

        var_in = d2 * inv_nm1                             # (C, 1), unbiased
        dmu = mu_in - mu_ln
        var_ln = (jnp.sum(d2) + hw * jnp.sum(dmu * dmu)) * inv_nlnm1   # scalar, unbiased

        inv_std_in = lax.rsqrt(var_in + eps)              # EUP, not a VALU divide
        inv_std_ln = lax.rsqrt(var_ln + eps)

        # ---- fold rho-mix + affine into one per-channel FMA: out = x * S + T ----
        scale_mix = rho * inv_std_in + (1.0 - rho) * inv_std_ln
        shift_mix = rho * (mu_in * inv_std_in) + (1.0 - rho) * (mu_ln * inv_std_ln)
        S = gamma * scale_mix                             # (C, 1)
        T = beta - gamma * shift_mix                      # (C, 1)

        # ---- pass 3: chunk-wise normalize + affine, lane-dense stores ----
        for off in offs:
            o_ref[0, :, off:off + chunk] = (load(off) * S + T).astype(o_ref.dtype)

    return kernel


def adalin(x_nchw, gamma, beta, rho, eps=EPS, max_chunk=4096):
    """adaLIN forward.

    x_nchw: (B, C, H, W)   gamma, beta: (B, C)   rho: (1, C, 1, 1) parameter.
    dtype-preserving (f32 or bf16 I/O; internal stats are f32). Returns (B, C, H, W).
    """
    B, C, H, W = x_nchw.shape
    HW = H * W
    HW_pad = -(-HW // 128) * 128                          # lane-dense: multiple of 128

    x = x_nchw.reshape(B, C, HW)
    if HW_pad != HW:
        x = jnp.pad(x, ((0, 0), (0, 0), (0, HW_pad - HW)))

    # In-kernel chunk width: largest multiple of 128 dividing HW_pad, capped at max_chunk.
    if HW_pad <= max_chunk:
        chunk = HW_pad
    else:
        chunk = 128
        cap = max(128, (max_chunk // 128) * 128)
        for cand in range(cap, 127, -128):
            if HW_pad % cand == 0:
                chunk = cand
                break

    # Fold gamma/beta/rho into one (B, 3, C, 1) side input (single DMA per grid step).
    rho_bc = jnp.broadcast_to(jnp.reshape(rho, (1, C)), (B, C))
    gbr = jnp.stack(
        [jnp.reshape(gamma, (B, C)), jnp.reshape(beta, (B, C)), rho_bc], axis=1
    ).astype(jnp.float32).reshape(B, 3, C, 1)

    # Explicit VMEM budget: double-buffered in + out blocks + f32 chunk temps + slack.
    blk_bytes = C * HW_pad * x.dtype.itemsize
    needed = 4 * blk_bytes + 6 * C * chunk * 4 + (2 << 20)
    vmem_limit = int(min(max(needed, 32 << 20), 100 << 20))

    out = pl.pallas_call(
        _make_adalin_kernel(eps, C, HW, HW_pad, chunk),
        out_shape=jax.ShapeDtypeStruct((B, C, HW_pad), x_nchw.dtype),
        grid=(B,),
        in_specs=[
            pl.BlockSpec((1, C, HW_pad), lambda b: (b, 0, 0)),
            pl.BlockSpec((1, 3, C, 1), lambda b: (b, 0, 0, 0)),
        ],
        out_specs=pl.BlockSpec((1, C, HW_pad), lambda b: (b, 0, 0)),
        compiler_params=pltpu.CompilerParams(
            dimension_semantics=("parallel",),
            vmem_limit_bytes=vmem_limit,
        ),
    )(x, gbr)

    if HW_pad != HW:
        out = out[:, :, :HW]
    return out.reshape(B, C, H, W)


def _adalin_reference(x, gamma, beta, rho, eps=EPS):
    # Pure-JAX mirror of the PyTorch forward (unbiased variance).
    x = x.astype(jnp.float32)
    gamma = gamma.astype(jnp.float32)
    beta = beta.astype(jnp.float32)
    rho = rho.astype(jnp.float32)
    in_mean = jnp.mean(x, axis=(2, 3), keepdims=True)
    in_var = jnp.var(x, axis=(2, 3), keepdims=True, ddof=1)
    out_in = (x - in_mean) / jnp.sqrt(in_var + eps)
    ln_mean = jnp.mean(x, axis=(1, 2, 3), keepdims=True)
    ln_var = jnp.var(x, axis=(1, 2, 3), keepdims=True, ddof=1)
    out_ln = (x - ln_mean) / jnp.sqrt(ln_var + eps)
    out = rho * out_in + (1.0 - rho) * out_ln
    return out * gamma[:, :, None, None] + beta[:, :, None, None]


if __name__ == "__main__":
    key = jax.random.PRNGKey(0)

    def run_case(B, C, H, W, dtype, max_chunk, tol, k):
        kx, kg, kb = jax.random.split(k, 3)
        x = jax.random.normal(kx, (B, C, H, W), jnp.float32).astype(dtype)
        gamma = (jax.random.normal(kg, (B, C), jnp.float32) + 1.0).astype(dtype)
        beta = (0.1 * jax.random.normal(kb, (B, C), jnp.float32)).astype(dtype)
        rho = jnp.full((1, C, 1, 1), 0.9, jnp.float32).astype(dtype)  # module init 0.9

        out = adalin(x, gamma, beta, rho, max_chunk=max_chunk)
        out = jax.block_until_ready(out)
        assert out.shape == (B, C, H, W) and out.dtype == dtype

        expected = _adalin_reference(x, gamma, beta, rho)
        err = float(jnp.max(jnp.abs(out.astype(jnp.float32) - expected)))
        assert err < tol, f"max abs err {err} (shape {(B, C, H, W)}, dtype {dtype})"

    k0, k1, k2 = jax.random.split(key, 3)
    # primary small case: single chunk, no lane padding
    run_case(2, 8, 16, 16, jnp.float32, 4096, 1e-3, k0)
    # exercises multi-chunk sweep + lane padding/mask (HW=400 -> pad 512, chunk 128)
    run_case(1, 5, 20, 20, jnp.float32, 128, 1e-3, k1)
    # bf16 I/O path (halved HBM traffic on v6e/v7x; internal math stays f32)
    run_case(1, 8, 16, 16, jnp.bfloat16, 4096, 1e-1, k2)

    print("KERNEL_OK")
</pallas_src>

<mosaic_0001>
module attributes {stable_mosaic.version = 11 : i64} {
  func.func @kernel(%arg0: i32, %arg1: memref<1x8x256xf32, #tpu.memory_space<vmem>>, %arg2: memref<1x3x8x1xf32, #tpu.memory_space<vmem>>, %arg3: memref<1x8x256xf32, #tpu.memory_space<vmem>>) attributes {dimension_semantics = [#tpu.dimension_semantics<parallel>], iteration_bounds = array<i64: 2>, scalar_prefetch = 0 : i64, scratch_operands = 0 : i64, tpu.core_type = #tpu.core_type<tc>, window_params = [{transform_indices = @transform_0, window_bounds = array<i64: 1, 8, 256>}, {transform_indices = @transform_1, window_bounds = array<i64: 1, 3, 8, 1>}, {transform_indices = @transform_2, window_bounds = array<i64: 1, 8, 256>}]} {
    %c0 = arith.constant 0 : index
    %c0_0 = arith.constant 0 : index
    %c0_1 = arith.constant 0 : index
    %c0_2 = arith.constant 0 : index
    %0 = vector.load %arg2[%c0, %c0_0, %c0_1, %c0_2] : memref<1x3x8x1xf32, #tpu.memory_space<vmem>>, vector<1x1x8x1xf32>
    %1 = vector.shape_cast %0 : vector<1x1x8x1xf32> to vector<8x1xf32>
    %c0_3 = arith.constant 0 : index
    %c1 = arith.constant 1 : index
    %c0_4 = arith.constant 0 : index
    %c0_5 = arith.constant 0 : index
    %2 = vector.load %arg2[%c0_3, %c1, %c0_4, %c0_5] : memref<1x3x8x1xf32, #tpu.memory_space<vmem>>, vector<1x1x8x1xf32>
    %3 = vector.shape_cast %2 : vector<1x1x8x1xf32> to vector<8x1xf32>
    %c0_6 = arith.constant 0 : index
    %c2 = arith.constant 2 : index
    %c0_7 = arith.constant 0 : index
    %c0_8 = arith.constant 0 : index
    %4 = vector.load %arg2[%c0_6, %c2, %c0_7, %c0_8] : memref<1x3x8x1xf32, #tpu.memory_space<vmem>>, vector<1x1x8x1xf32>
    %5 = vector.shape_cast %4 : vector<1x1x8x1xf32> to vector<8x1xf32>
    %cst = arith.constant 0.000000e+00 : f32
    %6 = vector.broadcast %cst : f32 to vector<8x1xf32>
    %c0_9 = arith.constant 0 : index
    %c0_10 = arith.constant 0 : index
    %c0_11 = arith.constant 0 : index
    %7 = vector.load %arg1[%c0_9, %c0_10, %c0_11] : memref<1x8x256xf32, #tpu.memory_space<vmem>>, vector<1x8x256xf32>
    %8 = vector.shape_cast %7 : vector<1x8x256xf32> to vector<8x256xf32>
    %cst_12 = arith.constant dense<0.000000e+00> : vector<8xf32>
    %9 = vector.multi_reduction <add>, %8, %cst_12 [1] : vector<8x256xf32> to vector<8xf32>
    %10 = vector.shape_cast %9 : vector<8xf32> to vector<8x1xf32>
    %11 = arith.addf %6, %10 : vector<8x1xf32>
    %cst_13 = arith.constant 3.906250e-03 : f32
    %12 = vector.broadcast %cst_13 : f32 to vector<8x1xf32>
    %13 = arith.mulf %11, %12 : vector<8x1xf32>
    %14 = vector.shape_cast %11 : vector<8x1xf32> to vector<1x8x1xf32>
    %cst_14 = arith.constant dense<0.000000e+00> : vector<1xf32>
    %15 = vector.multi_reduction <add>, %14, %cst_14 [1, 2] : vector<1x8x1xf32> to vector<1xf32>
    %16 = vector.shape_cast %15 : vector<1xf32> to vector<1x1x1xf32>
    %17 = vector.extract %16[0, 0, 0] : f32 from vector<1x1x1xf32>
    %cst_15 = arith.constant 4.8828125E-4 : f32
    %18 = arith.mulf %17, %cst_15 : f32
    %cst_16 = arith.constant 0.000000e+00 : f32
    %19 = vector.broadcast %cst_16 : f32 to vector<8x1xf32>
    %c0_17 = arith.constant 0 : index
    %c0_18 = arith.constant 0 : index
    %c0_19 = arith.constant 0 : index
    %20 = vector.load %arg1[%c0_17, %c0_18, %c0_19] : memref<1x8x256xf32, #tpu.memory_space<vmem>>, vector<1x8x256xf32>
    %21 = vector.shape_cast %20 : vector<1x8x256xf32> to vector<8x256xf32>
    %22 = vector.broadcast %13 : vector<8x1xf32> to vector<8x256xf32>
    %23 = arith.subf %21, %22 : vector<8x256xf32>
    %24 = arith.mulf %23, %23 : vector<8x256xf32>
    %cst_20 = arith.constant dense<0.000000e+00> : vector<8xf32>
    %25 = vector.multi_reduction <add>, %24, %cst_20 [1] : vector<8x256xf32> to vector<8xf32>
    %26 = vector.shape_cast %25 : vector<8xf32> to vector<8x1xf32>
    %27 = arith.addf %19, %26 : vector<8x1xf32>
    %cst_21 = arith.constant 0.00392156886 : f32
    %28 = vector.broadcast %cst_21 : f32 to vector<8x1xf32>
    %29 = arith.mulf %27, %28 : vector<8x1xf32>
    %30 = vector.broadcast %18 : f32 to vector<8x1xf32>
    %31 = arith.subf %13, %30 : vector<8x1xf32>
    %32 = vector.shape_cast %27 : vector<8x1xf32> to vector<1x8x1xf32>
    %cst_22 = arith.constant dense<0.000000e+00> : vector<1xf32>
    %33 = vector.multi_reduction <add>, %32, %cst_22 [1, 2] : vector<1x8x1xf32> to vector<1xf32>
    %34 = vector.shape_cast %33 : vector<1xf32> to vector<1x1x1xf32>
    %35 = vector.extract %34[0, 0, 0] : f32 from vector<1x1x1xf32>
    %36 = arith.mulf %31, %31 : vector<8x1xf32>
    %37 = vector.shape_cast %36 : vector<8x1xf32> to vector<1x8x1xf32>
    %cst_23 = arith.constant dense<0.000000e+00> : vector<1xf32>
    %38 = vector.multi_reduction <add>, %37, %cst_23 [1, 2] : vector<1x8x1xf32> to vector<1xf32>
    %39 = vector.shape_cast %38 : vector<1xf32> to vector<1x1x1xf32>
    %40 = vector.extract %39[0, 0, 0] : f32 from vector<1x1x1xf32>
    %cst_24 = arith.constant 2.560000e+02 : f32
    %41 = arith.mulf %cst_24, %40 : f32
    %42 = arith.addf %35, %41 : f32
    %cst_25 = arith.constant 4.88519785E-4 : f32
    %43 = arith.mulf %42, %cst_25 : f32
    %cst_26 = arith.constant 9.99999974E-6 : f32
    %44 = vector.broadcast %cst_26 : f32 to vector<8x1xf32>
    %45 = arith.addf %29, %44 : vector<8x1xf32>
    %46 = math.rsqrt %45 : vector<8x1xf32>
    %cst_27 = arith.constant 9.99999974E-6 : f32
    %47 = arith.addf %43, %cst_27 : f32
    %48 = math.rsqrt %47 : f32
    %49 = arith.mulf %5, %46 : vector<8x1xf32>
    %cst_28 = arith.constant 1.000000e+00 : f32
    %50 = vector.broadcast %cst_28 : f32 to vector<8x1xf32>
    %51 = arith.subf %50, %5 : vector<8x1xf32>
    %52 = vector.broadcast %48 : f32 to vector<8x1xf32>
    %53 = arith.mulf %51, %52 : vector<8x1xf32>
    %54 = arith.addf %49, %53 : vector<8x1xf32>
    %55 = arith.mulf %13, %46 : vector<8x1xf32>
    %56 = arith.mulf %5, %55 : vector<8x1xf32>
    %cst_29 = arith.constant 1.000000e+00 : f32
    %57 = vector.broadcast %cst_29 : f32 to vector<8x1xf32>
    %58 = arith.subf %57, %5 : vector<8x1xf32>
    %59 = arith.mulf %18, %48 : f32
    %60 = vector.broadcast %59 : f32 to vector<8x1xf32>
    %61 = arith.mulf %58, %60 : vector<8x1xf32>
    %62 = arith.addf %56, %61 : vector<8x1xf32>
    %63 = arith.mulf %1, %54 : vector<8x1xf32>
    %64 = arith.mulf %1, %62 : vector<8x1xf32>
    %65 = arith.subf %3, %64 : vector<8x1xf32>
    %c0_30 = arith.constant 0 : index
    %c0_31 = arith.constant 0 : index
    %c0_32 = arith.constant 0 : index
    %66 = vector.load %arg1[%c0_30, %c0_31, %c0_32] : memref<1x8x256xf32, #tpu.memory_space<vmem>>, vector<1x8x256xf32>
    %67 = vector.shape_cast %66 : vector<1x8x256xf32> to vector<8x256xf32>
    %68 = vector.broadcast %63 : vector<8x1xf32> to vector<8x256xf32>
    %69 = arith.mulf %67, %68 : vector<8x256xf32>
    %70 = vector.broadcast %65 : vector<8x1xf32> to vector<8x256xf32>
    %71 = arith.addf %69, %70 : vector<8x256xf32>
    %c0_33 = arith.constant 0 : index
    %c0_34 = arith.constant 0 : index
    %c0_35 = arith.constant 0 : index
    %72 = vector.load %arg3[%c0_33, %c0_34, %c0_35] : memref<1x8x256xf32, #tpu.memory_space<vmem>>, vector<1x8x256xf32>
    %73 = vector.shape_cast %72 : vector<1x8x256xf32> to vector<8x256xf32>
    %74 = vector.shape_cast %71 : vector<8x256xf32> to vector<1x8x256xf32>
    tpu.vector_store %arg3[%c0_33, %c0_34, %c0_35], %74 {strides = array<i32>} : memref<1x8x256xf32, #tpu.memory_space<vmem>>, vector<1x8x256xf32>,
    return
  }
  func.func @transform_0(%arg0: i32) -> (i32, i32, i32) {
    %c0_i32 = arith.constant 0 : i32
    %c0_i32_0 = arith.constant 0 : i32
    %c0_i32_1 = arith.constant 0 : i32
    return %arg0, %c0_i32, %c0_i32_0 : i32, i32, i32
  }
  func.func @transform_1(%arg0: i32) -> (i32, i32, i32, i32) {
    %c0_i32 = arith.constant 0 : i32
    %c0_i32_0 = arith.constant 0 : i32
    %c0_i32_1 = arith.constant 0 : i32
    %c0_i32_2 = arith.constant 0 : i32
    return %arg0, %c0_i32, %c0_i32_0, %c0_i32_1 : i32, i32, i32, i32
  }
  func.func @transform_2(%arg0: i32) -> (i32, i32, i32) {
    %c0_i32 = arith.constant 0 : i32
    %c0_i32_0 = arith.constant 0 : i32
    %c0_i32_1 = arith.constant 0 : i32
    return %arg0, %c0_i32, %c0_i32_0 : i32, i32, i32
  }
}

</mosaic_0001>

<bundles_post_ra>
// kernel: tpu_custom_call.1
= control target key start
LH: loop header
LB: loop body
LE: loop exit
PB: predicated region body
PF: predicated region fallthrough
CT: control target
= control target key end

     0   :  { %7 = vsyncpa [#allocation3], 0  ;;  %s629_s0 = inlined_call_operand.vmem [shape: f32[2,8,256], index: 0, kind: input, shape index: {}]   ;;  %s630_s1 = inlined_call_operand.vmem [shape: f32[2,3,8,1], index: 1, kind: input, shape index: {}]   ;;  %s631_s2 = inlined_call_operand.hbm [shape: f32[2,8,256], index: 2, kind: output, shape index: {}]  }
   0x1   :  { %9 = vsyncpa [#allocation3 + $0x1], 0  ;;  %s496_s9 = smov 0   ;;  %s498_s10 = smov 0  }
   0x2   :  { %s500_s11 = smov 0   ;;  %s502_s12 = smov 0  }
   0x3 LB: > { %s517_s13 = sadd.s32 4294967295, %s477_s12   ;;  %s343_s14 = sadd.s32 4294967294, %s477_s12   ;;  %s477_s12 = sphi %s502_s12, %s637_s12   ;;  %s473_s11 = sphi %s500_s11, %s636_s11   ;;  %s469_s10 = sphi %s498_s10, %s635_s10   ;;  %s465_s9 = sphi %s496_s9, %s634_s9  }
   0x4   : > { %s521_s15 = sadd.s32 1, %s477_s12   ;;  %s74_s16 = sadd.s32 1, %s473_s11 }
   0x5   : > { %s71_s17 = ssub.s32 %s477_s12, %s521_s15  ;;  %p84_p0 = scmp.ne.s32.totalorder %s473_s11, %s469_s10 }
   0x6   : > { %p72_p1 = scmp.eq.s32.totalorder %s71_s17, 0  ;;  %p85_p2 = scmp.eq.s32.totalorder %s517_s13, 1 }
   0x7   : > { %p90_p3 = scmp.ne.s32.totalorder %s469_s10, %s465_s9  ;;  %p91_p4 = scmp.eq.s32.totalorder %s343_s14, 1 }
   0x8   : > { %s532_s18 = scalar_select %p72_p1, %s473_s11, %s74_s16  }
   0x9   : > { %p534_p5 = por %p85_p2, %p84_p0  ;;  %p538_p6 = por %p91_p4, %p90_p3 }
   0xa   : > { %p346_p7 = scmp.ge.s32.totalorder %s477_s12, 1  ;;  %p125_p8 = scmp.lt.s32.totalorder %s477_s12, 3 }
   0xc   : > { %p126_p9 = pnand %p346_p7, %p125_p8 }
   0xd   : > { %p152_p10 = scmp.lt.s32.totalorder (!%p126_p9), %s517_s13, 1  ;;  %vm174_vm0 = vcmask (!%p126_p9), 7168   ;;  %v479_v38 = vmov (!%p126_p9), 0   ;;  %s359_s23 = sshll.u32 (!%p126_p9), %s517_s13, 8 }
   0xe   : > { %129 = sbr.rel (%p126_p9) target bundleno = 812 (0x32c), region = 28  ;;  %409 = vset.pattern.permute.xlu1 (!%p126_p9), %v479_v38  ;;  %410 = vset.pattern.permute.xlu0 (!%p126_p9), %v479_v38 }
  0x15   : > { %s546_s21 = scalar_select %p152_p10, %s517_s13, 1 }
  0x17   : > { %s358_s22 = sshll.u32 %s546_s21, 4  ;;  %s360_s6 = smul.u32 24, %s546_s21 }
  0x18   : > { %s156_s25 = scalar_lea.vmem %s629_s0, %s358_s22  ;;  %s149_s21 = sand.u32 1, %s469_s10  }
  0x19   : > { %v552_v0 = vld [vmem:[%s156_s25] sm:$0xff]  ;;  %v554_v1 = vld [vmem:[%s156_s25 + $0x8] sm:$0xff]  ;;  %s161_s14 = scalar_lea.vmem %s630_s1, %s360_s6  ;;  %s347_s22 = sshll.u32 %s149_s21, 4 }
  0x1a   : > { %v169_v2 = vadd.f32 %v554_v1, %v552_v0  ;;  %v352_v44 = vld [vmem:[%s161_s14 + $0x10] sm:$0xff]  ;;  %v162_v51 = vld [vmem:[%s161_s14] sm:$0xff]  ;;  %v351_v57 = vld [vmem:[%s161_s14 + $0x8] sm:$0xff]  ;;  %s151_s24 = scalar_lea.vmem [#allocation2], %s347_s22  ;;  %s258_s13 = scalar_lea.sflag [#allocation3], %s149_s21 }
  0x1b   : > { %v228_v45 = vsub.f32 1.0, %v352_v44  ;;  %s272_s25 = sshll.u32 %s151_s24, 4  ;;  %s589_s25 = int_to_ptr.vmem [resolvable:$true] %s272_s25 }
  0x1c   : > { %170 = vadd.xlane.f32.xlu0 %v169_v2 }
  0xa9   : > { %v171_v3 = vpop.xlane.xlu0 %170 }
  0xaa   : > { %v558_v4 = vmul.f32 0.00390625, %v171_v3  ;;  %v175_v5 = vsel %vm174_vm0, %v171_v3, 0.0 }
  0xab   : > { %176 = vadd.xlane.f32.xlu0 %v175_v5 }
  0xac   : > { %v186_v6 = vsub.f32 %v552_v0, %v558_v4  ;;  %v187_v7 = vsub.f32 %v554_v1, %v558_v4 }
  0xae   : > { %v188_v8 = vmul.f32 %v186_v6, %v186_v6  ;;  %v189_v9 = vmul.f32 %v187_v7, %v187_v7 }
  0xb0   : > { %v190_v10 = vadd.f32 %v189_v9, %v188_v8 }
  0xb2   : > { %191 = vadd.xlane.f32.xlu1 %v190_v10 }
 0x138   : > { %v177_v11 = vpop.xlane.xlu0 %176 }
 0x139   : > { %v178_v12 = vrot.slane %v177_v11, 4 }
 0x13b   : > { %v179_v13 = vadd.f32 %v178_v12, %v177_v11 }
 0x13d   : > { %v180_v14 = vrot.slane %v179_v13, 2 }
 0x13f   : > { %v192_v15 = vpop.xlane.xlu1 %191  ;;  %v181_v16 = vadd.f32 %v180_v14, %v179_v13 }
 0x140   : > { %v197_v17 = vsel %vm174_vm0, %v192_v15, 0.0  ;;  %v194_v41 = vmul.f32 0.003921569, %v192_v15 }
 0x141   : > { %198 = vadd.xlane.f32.xlu1 %v197_v17  ;;  %v182_v18 = vrot.slane %v181_v16, 1 }
 0x142   : > { %v221_v42 = vadd.f32 1e-05, %v194_v41 }
 0x143   : > { %v183_v19 = vadd.f32 %v182_v18, %v181_v16 }
 0x145   : > { %361 = vpush %v183_v19 }
 0x176   : > { %s566_s26 = spop %361 }
 0x177   : > { %s185_s27 = smul.f32 0.00048828125, %s566_s26 }
 0x179   : > { %v195_v20 = vstv %s185_s27 }
 0x17a   : > { %v196_v21 = vsub.f32 %v558_v4, %v195_v20 }
 0x17c   : > { %v207_v22 = vmul.f32 %v196_v21, %v196_v21 }
 0x17e   : > { %v208_v23 = vsel %vm174_vm0, %v207_v22, 0.0 }
 0x17f   : > { %209 = vadd.xlane.f32.xlu0 %v208_v23 }
 0x1ce   : > { %v199_v24 = vpop.xlane.xlu1 %198 }
 0x1cf   : > { %v200_v25 = vrot.slane %v199_v24, 4 }
 0x1d1   : > { %v201_v26 = vadd.f32 %v200_v25, %v199_v24 }
 0x1d3   : > { %v202_v27 = vrot.slane %v201_v26, 2 }
 0x1d5   : > { %v203_v28 = vadd.f32 %v202_v27, %v201_v26 }
 0x1d7   : > { %v204_v29 = vrot.slane %v203_v28, 1 }
 0x1d9   : > { %v205_v30 = vadd.f32 %v204_v29, %v203_v28 }
 0x1db   : > { %363 = vpush %v205_v30 }
 0x20c   : > { %v210_v31 = vpop.xlane.xlu0 %209  ;;  %s364_s28 = spop %363 }
 0x20d   : > { %v211_v32 = vrot.slane %v210_v31, 4 }
 0x20f   : > { %v212_v33 = vadd.f32 %v211_v32, %v210_v31 }
 0x211   : > { %v213_v34 = vrot.slane %v212_v33, 2 }
 0x213   : > { %v214_v35 = vadd.f32 %v213_v34, %v212_v33 }
 0x215   : > { %v215_v36 = vrot.slane %v214_v35, 1 }
 0x217   : > { %v216_v37 = vadd.f32 %v215_v36, %v214_v35 }
 0x219   : > { %365 = vpush %v216_v37 }
 0x24a   : > { %s366_s29 = spop %365 }
 0x24b   : > { %s218_s30 = smul.f32 256.0, %s366_s29  ;;  %s415_s29 = scalar_lea.vmem %s589_s25, 256 }
 0x24c   : > { %p416_p11 = scmp.ne.s32.totalorder %s589_s25, %s415_s29 }
 0x24d   : > { %s219_s3 = sadd.f32 %s364_s28, %s218_s30  ;;  %s587_s28 = scalar_lea.hbm %s631_s2, %s359_s23 }
 0x24e   : > { %p417_p12 = pnand %p416_p11, %p534_p5  ;;  %s480_s30 = smov [#allocation2]  }
 0x24f   : > { %s220_s4 = smul.f32 0.0004885198, %s219_s3  ;;  %s419_s3 = sshll.u32 %s480_s30, 4  ;;  %s420_s3 = int_to_ptr.vmem [resolvable:$false] %s419_s3 }
 0x250   : > { %p418_p13 = pneg %p417_p12  ;;  %p422_p0 = scmp.lt.s32.totalorder %s589_s25, %s420_s3 }
 0x251   : > { %s223_s5 = sadd.f32 1e-05, %s220_s4  ;;  %s421_s4 = scalar_lea.vmem %s420_s3, 512 }
 0x252   : > { %p423_p1 = scmp.lt.s32.totalorder %s421_s4, %s415_s29 }
 0x253   : > { %v224_v39 = vstv %s223_s5 }
 0x254   : > { %411 = vrsqrt.f32 %v224_v39  ;;  %p424_p2 = por %p423_p1, %p422_p0 }
 0x255   : > { %413 = vrsqrt.f32 %v221_v42 }
 0x256   : > { %p425_p3 = pnand %p424_p2, %p418_p13 }
 0x25e   : > { %v412_v40 = vpop.eup %411 }
 0x25f   : > { %367 = vpush %v412_v40  ;;  %v414_v43 = vpop.eup %413 }
 0x260   : > { %v232_v46 = vmul.f32 %v414_v43, %v558_v4  ;;  %v227_v48 = vmul.f32 %v414_v43, %v352_v44 }
 0x262   : > { %v233_v53 = vmul.f32 %v352_v44, %v232_v46 }
 0x290   : > { %s368_s16 = spop %367 }
 0x291   : > { %v229_v47 = vstv %s368_s16  ;;  %s234_s17 = smul.f32 %s368_s16, %s185_s27 }
 0x292   : > { %v230_v49 = vmul.f32 %v229_v47, %v228_v45 }
 0x293   : > { %v235_v50 = vstv %s234_s17 }
 0x294   : > { %v231_v52 = vadd.f32 %v230_v49, %v227_v48  ;;  %v236_v54 = vmul.f32 %v235_v50, %v228_v45 }
 0x296   : > { %v237_v55 = vadd.f32 %v236_v54, %v233_v53  ;;  %v238_v56 = vmul.f32 %v231_v52, %v162_v51 }
 0x298   : > { %243 = vperm.xlu1 %409, %v238_v56   ;;  %v239_v58 = vmul.f32 %v237_v55, %v162_v51 }
 0x29a   : > { %v240_v59 = vsub.f32 %v351_v57, %v239_v58 }
 0x29c   : > { %250 = vperm.xlu0 %410, %v240_v59  }
 0x317   : > { %v244_v60 = vpop.permute.xlu1 %243 }
 0x318   : > { %v246_v61 = vmul.f32 %v244_v60, %v552_v0  ;;  %v247_v62 = vmul.f32 %v244_v60, %v554_v1 }
 0x31b   : > { %v251_v63 = vpop.permute.xlu0 %250 }
 0x31c   : > { %v253_v2 = vadd.f32 %v251_v63, %v246_v61  ;;  %v254_v3 = vadd.f32 %v251_v63, %v247_v62 }
 0x31e   : > { %255 = vst [vmem:[%s151_s24] sm:$0xff] %v253_v2  ;;  %256 = vst [vmem:[%s151_s24 + $0x8] sm:$0xff] %v254_v3 }
 0x31f   : > { %428 = shalt.err (!%p425_p3)
}
 0x320   : > { %s429_s5 = scalar_lea.hbm %s587_s28, 256  ;;  %s433_s8 = scalar_lea.hbm %s631_s2, 512 }
 0x321   : > { %p430_p4 = scmp.ne.s32.totalorder %s587_s28, %s429_s5  ;;  %p434_p9 = scmp.lt.u32.totalorder %s587_s28, %s631_s2 }
 0x322   : > { %p435_p10 = scmp.lt.u32.totalorder %s433_s8, %s429_s5  ;;  %p437_p12 = scmp.lt.u32.totalorder %s429_s5, %s587_s28 }
 0x323   : > { %p431_p7 = pnand %p430_p4, %p534_p5 }
 0x324   : > { %p436_p11 = por %p435_p10, %p434_p9 }
 0x325   : > { %p432_p8 = pneg %p431_p7 }
 0x326   : > { %p438_p13 = por %p437_p12, %p436_p11 }
 0x328   : > { %p439_p0 = pnand %p438_p13, %p432_p8 }
 0x32a   : > { %442 = shalt.err (!%p439_p0)
}
 0x32b   : > { %369 = dma.vmem_to_hbm [thread:$0]  (%p534_p5), %s589_s25, 256, %s587_s28, %s258_s13  }
 0x32c PF: > { %p375_p1 = scmp.ge.s32.totalorder %s477_s12, 2  ;;  %s284_s17 = sand.u32 1, %s465_s9  }
 0x32d   : > { %s285_s21 = scalar_lea.sflag [#allocation3], %s284_s17 }
 0x32e   : > { %p372_p2 = pnand %p375_p1, %p538_p6 }
 0x330   : > { %460 = dma.done.wait (!%p372_p2), %s285_s21, 256  }
 0x331   : > { %462 = vsyncadd (!%p372_p2), %s285_s21, 4294967040  ;;  %p12_p3 = scmp.ge.s32.totalorder %s521_s15, 4   ;;  %s634_s9 = smov %s469_s10 }
 0x332   : > { %s635_s10 = smov %s473_s11  ;;  %s636_s11 = smov %s532_s18 }
 0x333   : > { %s637_s12 = smov %s521_s15  ;;  %14 = sbr.rel (!%p12_p3) target bundleno = 3 (0x3), region = 68 }
 0x33a   :  { %290 = vsyncpa [#allocation3], 1 }
 0x33b   :  { %292 = vsyncpa [#allocation3 + $0x1], 1 }

</bundles_post_ra>
